<compile_context>
chip_gen: v7x
topology: tpu7x:2x2x1
jax: 0.10.0
libtpu: 0.0.40
codegen_flags: <defaults>
</compile_context>

<pallas_src>
import functools

import jax
import jax.numpy as jnp
from jax.experimental import pallas as pl
from jax.experimental.pallas import tpu as pltpu

SUNRGBD_FRQ = [0.3829, 0.452448, 0.637584, 0.377464, 0.585595, 0.479574,
               0.781544, 0.982534, 1.017466, 0.624581, 2.589096, 0.980794,
               0.92034, 0.667984, 1.172291, 0.86224, 0.921714, 2.154782,
               1.187832, 1.178115, 1.848545, 1.428922, 2.849658, 0.771605,
               1.656668, 4.483506, 2.209922, 1.12028, 2.790182, 0.706519,
               3.994768, 2.220004, 0.972934, 1.481525, 5.342475, 0.750738,
               4.040773]  # 37 classes (SUNRGBD mode)


def _round_up(x, m):
    return (x + m - 1) // m * m


def _ce_alia_kernel(thresh, hw, block, chunk, n_chunks, tail,
                    w_ref, x_ref, t_ref, c_ref,
                    loss_ref, mask_ref, thr_ref):
    """One (image, pixel-super-block) accumulator set.

    w_ref:   (C, 1)        class weights (resident)
    x_ref:   (C, block)    logits, pixels on lanes (native dtype; cast per chunk)
    t_ref:   (1, block)    raw integer targets (0 = ignore)
    c_ref:   (1, block)    confidence ("logits" arg of the module)
    outputs: (1, chunk)    lane-partial sums, resident across the inner pixel axis
    """
    # Zero accumulators at the first inner pixel-block of this (image, super-block).
    @pl.when(pl.program_id(2) == 0)
    def _():
        loss_ref[...] = jnp.zeros_like(loss_ref)
        mask_ref[...] = jnp.zeros_like(mask_ref)
        thr_ref[...] = jnp.zeros_like(thr_ref)

    w = w_ref[...]                                               # (C, 1) f32
    n_classes = x_ref.shape[0]
    # Hoisted out of the chunk loop (JAX does not CSE iota/broadcast).
    cls = jax.lax.broadcasted_iota(jnp.int32, (n_classes, chunk), 0)
    if tail:
        lane = jax.lax.broadcasted_iota(jnp.int32, (1, chunk), 1)
        blk = pl.program_id(1) * pl.num_programs(2) + pl.program_id(2)
        base_px = blk * block

    def body(ci, carry):
        loss_acc, mask_acc, thr_acc = carry
        off = pl.multiple_of(ci * chunk, chunk)
        x = x_ref[:, pl.ds(off, chunk)].astype(jnp.float32)      # (C, chunk)
        t = t_ref[:, pl.ds(off, chunk)]                          # (1, chunk) i32
        conf = c_ref[:, pl.ds(off, chunk)]                       # (1, chunk)

        has_t = t > 0
        t_m = jnp.where(has_t, t - 1, t)                         # shifted target in [0, C)

        # Stable log-softmax pieces; (x - m) reused for both LSE and the gather.
        m = jnp.max(x, axis=0, keepdims=True)                    # (1, chunk)
        xm = x - m                                               # (C, chunk)
        log_s = jnp.log(jnp.sum(jnp.exp(xm), axis=0, keepdims=True))   # (1, chunk)

        # One-hot gathers with the weight folded into the select (no w*(lse-x) pass).
        onehot = cls == t_m                                      # (C, chunk)
        xm_t = jnp.sum(jnp.where(onehot, xm, 0.0), axis=0, keepdims=True)
        w_t = jnp.sum(jnp.where(onehot, w, 0.0), axis=0, keepdims=True)
        loss_px = w_t * (log_s - xm_t)                           # w[t] * -log_softmax[t]

        thr_px = (conf >= thresh).astype(jnp.float32)
        if tail:
            in_rng = (base_px + off + lane) < hw                 # mask ragged hw tail
            valid = jnp.logical_and(has_t, in_rng)
            thr_px = jnp.where(in_rng, thr_px, 0.0)
        else:
            valid = has_t

        return (loss_acc + jnp.where(valid, loss_px, 0.0),       # where: OOB-garbage safe
                mask_acc + valid.astype(jnp.float32),
                thr_acc + thr_px)

    init = (loss_ref[...], mask_ref[...], thr_ref[...])
    loss_acc, mask_acc, thr_acc = jax.lax.fori_loop(
        0, n_chunks, body, init, unroll=min(n_chunks, 8))
    loss_ref[...] = loss_acc
    mask_ref[...] = mask_acc
    thr_ref[...] = thr_acc


def cross_entropy_2d_u_alia(inputs_nchw, targets, conf_logits, weight,
                            thresh=0.95, block_px=16384, chunk_px=512):
    """Returns (loss_mean, thresh_frac) — same two scalars as the PyTorch module."""
    n, c, h, wdt = inputs_nchw.shape
    hw = h * wdt

    # Tile geometry (pixels on the lane axis).
    chunk_cap = _round_up(chunk_px, 128)
    if hw <= chunk_cap:
        chunk = hw                 # full-extent lane block: no padding, no OOB
        block = hw
    else:
        chunk = chunk_cap
        block = max(chunk, min(block_px // chunk * chunk, hw // chunk * chunk))
    n_chunks = block // chunk
    n_blocks = pl.cdiv(hw, block)
    hw_pad = n_blocks * block
    tail = hw_pad != hw            # ragged tail handled in-kernel (no jnp.pad)

    # Split the pixel-block axis so v7x's second TensorCore gets work at N==1.
    n_outer = 2 if (n_blocks >= 2 and n_blocks % 2 == 0) else 1
    n_inner = n_blocks // n_outer

    # Glue: pure reshapes only — logits keep their native dtype (bf16 OK, cast
    # per-chunk in the kernel); only the tiny targets/weights are converted.
    x3 = inputs_nchw.reshape(n, c, hw)
    t3 = targets.reshape(n, 1, hw).astype(jnp.int32)
    c3 = conf_logits.reshape(n, 1, hw)
    w2 = weight.reshape(c, 1).astype(jnp.float32)

    grid = (n, n_outer, n_inner)
    kernel = functools.partial(_ce_alia_kernel, float(thresh), hw, block, chunk,
                               n_chunks, tail)

    px_map = lambda i, po, pi: (i, 0, po * n_inner + pi)
    out_map = lambda i, po, pi: (i * n_outer + po, 0, 0)
    out_shape = tuple(jax.ShapeDtypeStruct((n * n_outer, 1, chunk), jnp.float32)
                      for _ in range(3))

    loss_acc, mask_acc, thr_acc = pl.pallas_call(
        kernel,
        out_shape=out_shape,
        grid_spec=pltpu.PrefetchScalarGridSpec(
            num_scalar_prefetch=0,
            grid=grid,
            in_specs=[
                pl.BlockSpec((c, 1), lambda i, po, pi: (0, 0)),      # class weights
                pl.BlockSpec((None, c, block), px_map),              # logits
                pl.BlockSpec((None, 1, block), px_map),              # targets
                pl.BlockSpec((None, 1, block), px_map),              # confidence
            ],
            out_specs=[
                pl.BlockSpec((None, 1, chunk), out_map),
                pl.BlockSpec((None, 1, chunk), out_map),
                pl.BlockSpec((None, 1, chunk), out_map),
            ],
        ),
        compiler_params=pltpu.CompilerParams(
            dimension_semantics=("parallel", "parallel", "arbitrary")),
    )(w2, x3, t3, c3)

    # Tiny final cross-lane reductions stay in the XLA wrapper.
    loss_sum = jnp.sum(loss_acc)
    mask_sum = jnp.sum(mask_acc)
    thr_sum = jnp.sum(thr_acc)

    ce = loss_sum / mask_sum  # NaN when no valid pixel, matching PyTorch behavior
    thresh_frac = thr_sum / jnp.float32(conf_logits.size)
    # losses * thresh_mask (bool) then .mean()  ==  ce * mean(thresh_mask)
    return ce * thresh_frac, thresh_frac


def _reference(inputs_nchw, targets, conf_logits, weight, thresh=0.95):
    mask = targets > 0
    t_m = jnp.where(mask, targets - 1, targets)
    logp = jax.nn.log_softmax(inputs_nchw.astype(jnp.float32), axis=1)      # (N,C,H,W)
    logp_t = jnp.take_along_axis(logp, t_m[:, None], axis=1)[:, 0]          # (N,H,W)
    w_t = weight[t_m]
    loss_all = -w_t * logp_t
    ce = jnp.sum(jnp.where(mask, loss_all, 0.0)) / jnp.sum(mask.astype(jnp.float32))
    thresh_frac = jnp.mean((conf_logits >= thresh).astype(jnp.float32))
    return ce * thresh_frac, thresh_frac


if __name__ == "__main__":
    key = jax.random.PRNGKey(0)
    k1, k2, k3 = jax.random.split(key, 3)

    N, C, H, W = 2, len(SUNRGBD_FRQ), 16, 16          # C = 37 (SUNRGBD)
    weight = jnp.asarray(SUNRGBD_FRQ, dtype=jnp.float32)

    inputs = jax.random.normal(k1, (N, C, H, W), dtype=jnp.float32)
    targets = jax.random.randint(k2, (N, H, W), 0, C + 1, dtype=jnp.int32)
    conf = jax.random.uniform(k3, (N, H, W), dtype=jnp.float32)

    loss_mean, thr_frac = cross_entropy_2d_u_alia(inputs, targets, conf, weight)
    jax.block_until_ready((loss_mean, thr_frac))
    ref_loss, ref_frac = _reference(inputs, targets, conf, weight)
    assert jnp.allclose(loss_mean, ref_loss, rtol=1e-4, atol=1e-5), (loss_mean, ref_loss)
    assert jnp.allclose(thr_frac, ref_frac, rtol=1e-6, atol=1e-6), (thr_frac, ref_frac)

    # Second check: ragged H*W (576 px -> two 512-px blocks, partial last block)
    # exercises the in-kernel tail mask and the parallel pixel super-block split.
    H2, W2 = 24, 24
    inputs2 = jax.random.normal(k1, (N, C, H2, W2), dtype=jnp.float32)
    targets2 = jax.random.randint(k2, (N, H2, W2), 0, C + 1, dtype=jnp.int32)
    conf2 = jax.random.uniform(k3, (N, H2, W2), dtype=jnp.float32)

    loss2, frac2 = cross_entropy_2d_u_alia(inputs2, targets2, conf2, weight)
    jax.block_until_ready((loss2, frac2))
    ref_loss2, ref_frac2 = _reference(inputs2, targets2, conf2, weight)
    assert jnp.allclose(loss2, ref_loss2, rtol=1e-4, atol=1e-5), (loss2, ref_loss2)
    assert jnp.allclose(frac2, ref_frac2, rtol=1e-6, atol=1e-6), (frac2, ref_frac2)

    print("KERNEL_OK")
</pallas_src>

<mosaic_0001>
module attributes {stable_mosaic.version = 11 : i64} {
  func.func @_ce_alia_kernel(%arg0: i32, %arg1: i32, %arg2: i32, %arg3: memref<37x1xf32, #tpu.memory_space<vmem>>, %arg4: memref<1x37x256xf32, #tpu.memory_space<vmem>>, %arg5: memref<1x1x256xi32, #tpu.memory_space<vmem>>, %arg6: memref<1x1x256xf32, #tpu.memory_space<vmem>>, %arg7: memref<1x1x256xf32, #tpu.memory_space<vmem>>, %arg8: memref<1x1x256xf32, #tpu.memory_space<vmem>>, %arg9: memref<1x1x256xf32, #tpu.memory_space<vmem>>) attributes {dimension_semantics = [#tpu.dimension_semantics<parallel>, #tpu.dimension_semantics<parallel>, #tpu.dimension_semantics<arbitrary>], iteration_bounds = array<i64: 2, 1, 1>, scalar_prefetch = 0 : i64, scratch_operands = 0 : i64, tpu.core_type = #tpu.core_type<tc>, window_params = [{pipeline_mode = #tpu.pipeline_mode<synchronous>, transform_indices = @transform_0, window_bounds = array<i64: 37, 1>}, {transform_indices = @transform_1, window_bounds = array<i64: 1, 37, 256>}, {transform_indices = @transform_2, window_bounds = array<i64: 1, 1, 256>}, {transform_indices = @transform_3, window_bounds = array<i64: 1, 1, 256>}, {transform_indices = @transform_4, window_bounds = array<i64: 1, 1, 256>}, {transform_indices = @transform_5, window_bounds = array<i64: 1, 1, 256>}, {transform_indices = @transform_6, window_bounds = array<i64: 1, 1, 256>}]} {
    %c0_i32 = arith.constant 0 : i32
    %0 = arith.cmpi eq, %arg2, %c0_i32 : i32
    %1 = arith.extui %0 : i1 to i32
    %c0_i32_0 = arith.constant 0 : i32
    %2 = arith.cmpi ne, %1, %c0_i32_0 : i32
    scf.if %2 {
      %cst_36 = arith.constant 0.000000e+00 : f32
      %69 = vector.broadcast %cst_36 : f32 to vector<1x256xf32>
      %c0_37 = arith.constant 0 : index
      %c0_38 = arith.constant 0 : index
      %c0_39 = arith.constant 0 : index
      %70 = vector.load %arg7[%c0_37, %c0_38, %c0_39] : memref<1x1x256xf32, #tpu.memory_space<vmem>>, vector<1x1x256xf32>
      %71 = vector.shape_cast %70 : vector<1x1x256xf32> to vector<1x256xf32>
      %72 = vector.shape_cast %69 : vector<1x256xf32> to vector<1x1x256xf32>
      tpu.vector_store %arg7[%c0_37, %c0_38, %c0_39], %72 {strides = array<i32>} : memref<1x1x256xf32, #tpu.memory_space<vmem>>, vector<1x1x256xf32>,
      %cst_40 = arith.constant 0.000000e+00 : f32
      %73 = vector.broadcast %cst_40 : f32 to vector<1x256xf32>
      %c0_41 = arith.constant 0 : index
      %c0_42 = arith.constant 0 : index
      %c0_43 = arith.constant 0 : index
      %74 = vector.load %arg8[%c0_41, %c0_42, %c0_43] : memref<1x1x256xf32, #tpu.memory_space<vmem>>, vector<1x1x256xf32>
      %75 = vector.shape_cast %74 : vector<1x1x256xf32> to vector<1x256xf32>
      %76 = vector.shape_cast %73 : vector<1x256xf32> to vector<1x1x256xf32>
      tpu.vector_store %arg8[%c0_41, %c0_42, %c0_43], %76 {strides = array<i32>} : memref<1x1x256xf32, #tpu.memory_space<vmem>>, vector<1x1x256xf32>,
      %cst_44 = arith.constant 0.000000e+00 : f32
      %77 = vector.broadcast %cst_44 : f32 to vector<1x256xf32>
      %c0_45 = arith.constant 0 : index
      %c0_46 = arith.constant 0 : index
      %c0_47 = arith.constant 0 : index
      %78 = vector.load %arg9[%c0_45, %c0_46, %c0_47] : memref<1x1x256xf32, #tpu.memory_space<vmem>>, vector<1x1x256xf32>
      %79 = vector.shape_cast %78 : vector<1x1x256xf32> to vector<1x256xf32>
      %80 = vector.shape_cast %77 : vector<1x256xf32> to vector<1x1x256xf32>
      tpu.vector_store %arg9[%c0_45, %c0_46, %c0_47], %80 {strides = array<i32>} : memref<1x1x256xf32, #tpu.memory_space<vmem>>, vector<1x1x256xf32>,
    } else {
    }
    %c0 = arith.constant 0 : index
    %c0_1 = arith.constant 0 : index
    %3 = vector.load %arg3[%c0, %c0_1] : memref<37x1xf32, #tpu.memory_space<vmem>>, vector<37x1xf32>
    %4 = tpu.iota {dimensions = array<i32: 0>} : vector<37x256xi32>
    %c0_2 = arith.constant 0 : index
    %c0_3 = arith.constant 0 : index
    %c0_4 = arith.constant 0 : index
    %5 = vector.load %arg7[%c0_2, %c0_3, %c0_4] : memref<1x1x256xf32, #tpu.memory_space<vmem>>, vector<1x1x256xf32>
    %6 = vector.shape_cast %5 : vector<1x1x256xf32> to vector<1x256xf32>
    %c0_5 = arith.constant 0 : index
    %c0_6 = arith.constant 0 : index
    %c0_7 = arith.constant 0 : index
    %7 = vector.load %arg8[%c0_5, %c0_6, %c0_7] : memref<1x1x256xf32, #tpu.memory_space<vmem>>, vector<1x1x256xf32>
    %8 = vector.shape_cast %7 : vector<1x1x256xf32> to vector<1x256xf32>
    %c0_8 = arith.constant 0 : index
    %c0_9 = arith.constant 0 : index
    %c0_10 = arith.constant 0 : index
    %9 = vector.load %arg9[%c0_8, %c0_9, %c0_10] : memref<1x1x256xf32, #tpu.memory_space<vmem>>, vector<1x1x256xf32>
    %10 = vector.shape_cast %9 : vector<1x1x256xf32> to vector<1x256xf32>
    %c0_i32_11 = arith.constant 0 : i32
    %c256_i32 = arith.constant 256 : i32
    %11 = arith.muli %c0_i32_11, %c256_i32 : i32
    %12 = tpu.assume_multiple %11, 256 : i32
    %c0_12 = arith.constant 0 : index
    %c0_13 = arith.constant 0 : index
    %13 = arith.index_cast %12 : i32 to index
    %14 = vector.load %arg4[%c0_12, %c0_13, %13] : memref<1x37x256xf32, #tpu.memory_space<vmem>>, vector<1x37x256xf32>
    %15 = vector.shape_cast %14 : vector<1x37x256xf32> to vector<37x256xf32>
    %c0_14 = arith.constant 0 : index
    %c0_15 = arith.constant 0 : index
    %16 = arith.index_cast %12 : i32 to index
    %17 = vector.load %arg5[%c0_14, %c0_15, %16] : memref<1x1x256xi32, #tpu.memory_space<vmem>>, vector<1x1x256xi32>
    %18 = vector.shape_cast %17 : vector<1x1x256xi32> to vector<1x256xi32>
    %c0_16 = arith.constant 0 : index
    %c0_17 = arith.constant 0 : index
    %19 = arith.index_cast %12 : i32 to index
    %20 = vector.load %arg6[%c0_16, %c0_17, %19] : memref<1x1x256xf32, #tpu.memory_space<vmem>>, vector<1x1x256xf32>
    %21 = vector.shape_cast %20 : vector<1x1x256xf32> to vector<1x256xf32>
    %c0_i32_18 = arith.constant 0 : i32
    %22 = vector.broadcast %c0_i32_18 : i32 to vector<1x256xi32>
    %23 = arith.cmpi sgt, %18, %22 : vector<1x256xi32>
    %c1_i32 = arith.constant 1 : i32
    %24 = vector.broadcast %c1_i32 : i32 to vector<1x256xi32>
    %25 = arith.subi %18, %24 : vector<1x256xi32>
    %26 = arith.select %23, %25, %18 : vector<1x256xi1>, vector<1x256xi32>
    %cst = arith.constant dense<0xFF800000> : vector<256xf32>
    %27 = vector.multi_reduction <maximumf>, %15, %cst [0] : vector<37x256xf32> to vector<256xf32>
    %28 = vector.shape_cast %27 : vector<256xf32> to vector<1x256xf32>
    %29 = vector.broadcast %28 : vector<1x256xf32> to vector<37x256xf32>
    %30 = arith.subf %15, %29 : vector<37x256xf32>
    %31 = math.exp %30 : vector<37x256xf32>
    %cst_19 = arith.constant dense<0.000000e+00> : vector<256xf32>
    %32 = vector.multi_reduction <add>, %31, %cst_19 [0] : vector<37x256xf32> to vector<256xf32>
    %33 = vector.shape_cast %32 : vector<256xf32> to vector<1x256xf32>
    %34 = math.log %33 : vector<1x256xf32>
    %35 = vector.broadcast %26 : vector<1x256xi32> to vector<37x256xi32>
    %36 = arith.cmpi eq, %4, %35 : vector<37x256xi32>
    %cst_20 = arith.constant 0.000000e+00 : f32
    %37 = vector.broadcast %cst_20 : f32 to vector<37x256xf32>
    %38 = arith.select %36, %30, %37 : vector<37x256xi1>, vector<37x256xf32>
    %cst_21 = arith.constant dense<0.000000e+00> : vector<256xf32>
    %39 = vector.multi_reduction <add>, %38, %cst_21 [0] : vector<37x256xf32> to vector<256xf32>
    %40 = vector.shape_cast %39 : vector<256xf32> to vector<1x256xf32>
    %cst_22 = arith.constant 0.000000e+00 : f32
    %41 = vector.shape_cast %3 : vector<37x1xf32> to vector<37x1xf32>
    %42 = vector.broadcast %41 : vector<37x1xf32> to vector<37x256xf32>
    %43 = vector.broadcast %cst_22 : f32 to vector<37x256xf32>
    %44 = arith.select %36, %42, %43 : vector<37x256xi1>, vector<37x256xf32>
    %cst_23 = arith.constant dense<0.000000e+00> : vector<256xf32>
    %45 = vector.multi_reduction <add>, %44, %cst_23 [0] : vector<37x256xf32> to vector<256xf32>
    %46 = vector.shape_cast %45 : vector<256xf32> to vector<1x256xf32>
    %47 = arith.subf %34, %40 : vector<1x256xf32>
    %48 = arith.mulf %46, %47 : vector<1x256xf32>
    %cst_24 = arith.constant 0.949999988 : f32
    %49 = vector.broadcast %cst_24 : f32 to vector<1x256xf32>
    %50 = arith.cmpf oge, %21, %49 : vector<1x256xf32>
    %51 = arith.extui %50 : vector<1x256xi1> to vector<1x256xi32>
    %52 = arith.sitofp %51 : vector<1x256xi32> to vector<1x256xf32>
    %cst_25 = arith.constant 0.000000e+00 : f32
    %53 = vector.broadcast %cst_25 : f32 to vector<1x256xf32>
    %54 = arith.select %23, %48, %53 : vector<1x256xi1>, vector<1x256xf32>
    %55 = arith.addf %6, %54 : vector<1x256xf32>
    %56 = arith.extui %23 : vector<1x256xi1> to vector<1x256xi32>
    %57 = arith.sitofp %56 : vector<1x256xi32> to vector<1x256xf32>
    %58 = arith.addf %8, %57 : vector<1x256xf32>
    %59 = arith.addf %10, %52 : vector<1x256xf32>
    %c1_i32_26 = arith.constant 1 : i32
    %c0_27 = arith.constant 0 : index
    %c0_28 = arith.constant 0 : index
    %c0_29 = arith.constant 0 : index
    %60 = vector.load %arg7[%c0_27, %c0_28, %c0_29] : memref<1x1x256xf32, #tpu.memory_space<vmem>>, vector<1x1x256xf32>
    %61 = vector.shape_cast %60 : vector<1x1x256xf32> to vector<1x256xf32>
    %62 = vector.shape_cast %55 : vector<1x256xf32> to vector<1x1x256xf32>
    tpu.vector_store %arg7[%c0_27, %c0_28, %c0_29], %62 {strides = array<i32>} : memref<1x1x256xf32, #tpu.memory_space<vmem>>, vector<1x1x256xf32>,
    %c0_30 = arith.constant 0 : index
    %c0_31 = arith.constant 0 : index
    %c0_32 = arith.constant 0 : index
    %63 = vector.load %arg8[%c0_30, %c0_31, %c0_32] : memref<1x1x256xf32, #tpu.memory_space<vmem>>, vector<1x1x256xf32>
    %64 = vector.shape_cast %63 : vector<1x1x256xf32> to vector<1x256xf32>
    %65 = vector.shape_cast %58 : vector<1x256xf32> to vector<1x1x256xf32>
    tpu.vector_store %arg8[%c0_30, %c0_31, %c0_32], %65 {strides = array<i32>} : memref<1x1x256xf32, #tpu.memory_space<vmem>>, vector<1x1x256xf32>,
    %c0_33 = arith.constant 0 : index
    %c0_34 = arith.constant 0 : index
    %c0_35 = arith.constant 0 : index
    %66 = vector.load %arg9[%c0_33, %c0_34, %c0_35] : memref<1x1x256xf32, #tpu.memory_space<vmem>>, vector<1x1x256xf32>
    %67 = vector.shape_cast %66 : vector<1x1x256xf32> to vector<1x256xf32>
    %68 = vector.shape_cast %59 : vector<1x256xf32> to vector<1x1x256xf32>
    tpu.vector_store %arg9[%c0_33, %c0_34, %c0_35], %68 {strides = array<i32>} : memref<1x1x256xf32, #tpu.memory_space<vmem>>, vector<1x1x256xf32>,
    return
  }
  func.func @transform_0(%arg0: i32, %arg1: i32, %arg2: i32) -> (i32, i32) {
    %c0_i32 = arith.constant 0 : i32
    %c0_i32_0 = arith.constant 0 : i32
    %c0_i32_1 = arith.constant 0 : i32
    return %c0_i32, %c0_i32_0 : i32, i32
  }
  func.func @transform_1(%arg0: i32, %arg1: i32, %arg2: i32) -> (i32, i32, i32) {
    %c1_i32 = arith.constant 1 : i32
    %0 = arith.muli %arg1, %c1_i32 : i32
    %1 = arith.addi %0, %arg2 : i32
    %c0_i32 = arith.constant 0 : i32
    %c0_i32_0 = arith.constant 0 : i32
    return %arg0, %c0_i32, %1 : i32, i32, i32
  }
  func.func @transform_2(%arg0: i32, %arg1: i32, %arg2: i32) -> (i32, i32, i32) {
    %c1_i32 = arith.constant 1 : i32
    %0 = arith.muli %arg1, %c1_i32 : i32
    %1 = arith.addi %0, %arg2 : i32
    %c0_i32 = arith.constant 0 : i32
    %c0_i32_0 = arith.constant 0 : i32
    return %arg0, %c0_i32, %1 : i32, i32, i32
  }
  func.func @transform_3(%arg0: i32, %arg1: i32, %arg2: i32) -> (i32, i32, i32) {
    %c1_i32 = arith.constant 1 : i32
    %0 = arith.muli %arg1, %c1_i32 : i32
    %1 = arith.addi %0, %arg2 : i32
    %c0_i32 = arith.constant 0 : i32
    %c0_i32_0 = arith.constant 0 : i32
    return %arg0, %c0_i32, %1 : i32, i32, i32
  }
  func.func @transform_4(%arg0: i32, %arg1: i32, %arg2: i32) -> (i32, i32, i32) {
    %c1_i32 = arith.constant 1 : i32
    %0 = arith.muli %arg0, %c1_i32 : i32
    %1 = arith.addi %0, %arg1 : i32
    %c0_i32 = arith.constant 0 : i32
    %c0_i32_0 = arith.constant 0 : i32
    %c0_i32_1 = arith.constant 0 : i32
    return %1, %c0_i32, %c0_i32_0 : i32, i32, i32
  }
  func.func @transform_5(%arg0: i32, %arg1: i32, %arg2: i32) -> (i32, i32, i32) {
    %c1_i32 = arith.constant 1 : i32
    %0 = arith.muli %arg0, %c1_i32 : i32
    %1 = arith.addi %0, %arg1 : i32
    %c0_i32 = arith.constant 0 : i32
    %c0_i32_0 = arith.constant 0 : i32
    %c0_i32_1 = arith.constant 0 : i32
    return %1, %c0_i32, %c0_i32_0 : i32, i32, i32
  }
  func.func @transform_6(%arg0: i32, %arg1: i32, %arg2: i32) -> (i32, i32, i32) {
    %c1_i32 = arith.constant 1 : i32
    %0 = arith.muli %arg0, %c1_i32 : i32
    %1 = arith.addi %0, %arg1 : i32
    %c0_i32 = arith.constant 0 : i32
    %c0_i32_0 = arith.constant 0 : i32
    %c0_i32_1 = arith.constant 0 : i32
    return %1, %c0_i32, %c0_i32_0 : i32, i32, i32
  }
}

</mosaic_0001>

<bundles_post_ra>
// kernel: tpu_custom_call.1
= control target key start
LH: loop header
LB: loop body
LE: loop exit
PB: predicated region body
PF: predicated region fallthrough
CT: control target
= control target key end

     0   :  { %s1642_s0 = inlined_call_operand.vmem [shape: f32[37,1], index: 0, kind: input, shape index: {}]   ;;  %s1643_s1 = inlined_call_operand.vmem [shape: f32[2,37,256], index: 1, kind: input, shape index: {}]   ;;  %s1644_s2 = inlined_call_operand.vmem [shape: s32[2,1,256], index: 2, kind: input, shape index: {}]   ;;  %s1645_s3 = inlined_call_operand.vmem [shape: f32[2,1,256], index: 3, kind: input, shape index: {}]   ;;  %s1646_s4 = inlined_call_operand.hbm [shape: f32[2,1,256], index: 4, kind: output, shape index: {0}]   ;;  %s1647_s5 = inlined_call_operand.hbm [shape: f32[2,1,256], index: 5, kind: output, shape index: {1}]   ;;  %s1648_s6 = inlined_call_operand.hbm [shape: f32[2,1,256], index: 6, kind: output, shape index: {2}]  }
   0x1   :  { %1651 = sst [smem:[#allocation9_spill]] %s1642_s0 }
   0x2   :  { %12 = vsyncpa [#allocation3], 0 }
   0x3   :  { %14 = vsyncpa [#allocation3 + $0x1], 0 }
   0x4   :  { %15 = vsyncpa [#allocation5], 0 }
   0x5   :  { %17 = vsyncpa [#allocation5 + $0x1], 0  ;;  %s1193_s21 = smov 0   ;;  %s1195_s22 = smov 0  }
   0x6   :  { %s1197_s23 = smov 0   ;;  %s1199_s24 = smov 0  }
   0x7   :  { %s1201_s25 = smov 0   ;;  %s1203_s26 = smov 0  }
   0x8 LB: > { %s889_s27 = sadd.s32 4294967295, %s1150_s26   ;;  %s1649_s28 = sadd.s32 4294967294, %s1150_s26   ;;  %s1150_s26 = sphi %s1203_s26, %s23_s26   ;;  %s1146_s25 = sphi %s1201_s25, %s1664_s25   ;;  %s1142_s24 = sphi %s1199_s24, %s1663_s24   ;;  %s1138_s23 = sphi %s1197_s23, %s1662_s23   ;;  %s1134_s22 = sphi %s1195_s22, %s1661_s22   ;;  %s1130_s21 = sphi %s1193_s21, %s1660_s21  }
   0x9   : > { %s42_s29 = sadd.s32 1, %s1146_s25  ;;  %s162_s30 = sadd.s32 1, %s1138_s23 }
   0xa   : > { %p44_p0 = scmp.ge.s32.totalorder %s42_s29, 2  ;;  %p172_p1 = scmp.ne.s32.totalorder %s1138_s23, %s1134_s22 }
   0xb   : > { %p173_p2 = scmp.eq.s32.totalorder %s889_s27, 1  ;;  %p178_p3 = scmp.ne.s32.totalorder %s1134_s22, %s1130_s21 }
   0xc   : > { %s1666_s29 = smov (%p44_p0, %s42_s29), 0  ;;  %p179_p5 = scmp.eq.s32.totalorder %s1649_s28, 1 }
   0xd   : > { %p1235_p4 = por %p173_p2, %p172_p1  ;;  %s159_s8 = ssub.s32 %s1146_s25, %s1666_s29 }
   0xe   : > { %p893_p6 = scmp.ge.s32.totalorder %s1150_s26, 1  ;;  %p160_p7 = scmp.eq.s32.totalorder %s159_s8, 0 }
   0xf   : > { %p1244_p8 = por %p179_p5, %p178_p3  ;;  %p299_p9 = scmp.lt.s32.totalorder %s1150_s26, 3 }
  0x10   : > { %s1250_s10 = scalar_select %p160_p7, %s1138_s23, %s162_s30  }
  0x11   : > { %p300_p10 = pnand %p893_p6, %p299_p9 }
  0x12   : > { %s1654_s0 = sld [smem:[#allocation9_spill]] (!%p300_p10)  ;;  %p364_p11 = scmp.lt.s32.totalorder (!%p300_p10), %s1142_s24, 1  ;;  %v403_v2 = vlaneseq (!%p300_p10)  ;;  %v1152_v3 = vmov (!%p300_p10), 0   ;;  %vm441_vm0 = vcmask (!%p300_p10), 1044480   ;;  %v1153_v52 = vmov (!%p300_p10), 0.0  }
  0x13   : > { %303 = sbr.rel (%p300_p10) target bundleno = 203 (0xcb), region = 36  ;;  %987 = vset.pattern.permute.xlu1 (!%p300_p10), %v1152_v3  ;;  %986 = vset.pattern.permute.xlu0 (!%p300_p10), %v1152_v3  ;;  %s1154_s16 = smov (!%p300_p10), [#allocation4]  }
  0x14   : > { %v1263_v4 = vshrl.u32 (!%p300_p10), %v403_v2, 7  ;;  %vm1353_vm12 = vcmp.lt.s32.totalorder (!%p300_p10), %v403_v2, 256 }
  0x16   : > { %v520_v9 = vsub.s32 (!%p300_p10), 0, %v1263_v4  ;;  %v524_v14 = vsub.s32 (!%p300_p10), 1, %v1263_v4  ;;  %v1297_v15 = vadd.s32 (!%p300_p10), 16, %v1263_v4  ;;  %v1302_v19 = vadd.s32 (!%p300_p10), 24, %v1263_v4 }
  0x17   : > { %v1312_v26 = vadd.s32 (!%p300_p10), 8, %v1263_v4  ;;  %v1327_v35 = vadd.s32 (!%p300_p10), 32, %v1263_v4 }
  0x18   : > { %v412_v0 = vld [vmem:[%s1654_s0 + $0x10] sm:$0xff] (!%p300_p10)  ;;  %v410_v1 = vld [vmem:[%s1654_s0] sm:$0xff] (!%p300_p10)  ;;  %v413_v5 = vld [vmem:[%s1654_s0 + $0x18] sm:$0xff] (!%p300_p10) }
  0x19   : > { %580 = vperm.xlu1 (!%p300_p10), %987, %v412_v0   ;;  %570 = vperm.xlu0 (!%p300_p10), %986, %v410_v1   ;;  %v411_v6 = vld [vmem:[%s1654_s0 + $0x8] sm:$0xff] (!%p300_p10)  ;;  %v414_v7 = vld [vmem:[%s1654_s0 + $0x20] sm:$0x1f] (!%p300_p10) }
  0x1a   : > { %s1260_s15 = scalar_select %p364_p11, %s1142_s24, 1 }
  0x1c   : > { %s917_s20 = smul.u32 80, %s1260_s15  ;;  %s898_s30 = sshll.u32 %s1260_s15, 1 }
  0x1d   : > { %s382_s12 = scalar_lea.vmem %s1644_s2, %s898_s30  ;;  %585 = vperm.xlu1 %987, %v413_v5   ;;  %575 = vperm.xlu0 %986, %v411_v6   ;;  %s393_s13 = scalar_lea.vmem %s1645_s3, %s898_s30 }
  0x1e   : > { %s371_s28 = scalar_lea.vmem %s1643_s1, %s917_s20  ;;  %v1284_v8 = vld [vmem:[%s382_s12] sm:$0x3]  ;;  %s1441_s15 = sand.u32 1, %s889_s27  }
  0x1f   : > { %v1287_v10 = vld [vmem:[%s371_s28] sm:$0xff]  ;;  %v1289_v11 = vld [vmem:[%s371_s28 + $0x8] sm:$0xff]  ;;  %v1291_v12 = vld [vmem:[%s371_s28 + $0x10] sm:$0xff]  ;;  %vm436_vm1 = vcmp.gt.s32.totalorder %v1284_v8, 0  ;;  %v900_v13 = vadd.s32 4294967295, %v1284_v8  ;;  %s1445_s30 = sshll.u32 %s1142_s24, 5 }
  0x20   : > { %v1299_v16 = vld [vmem:[%s371_s28 + $0x18] sm:$0xff]  ;;  %v428_v17 = vld [vmem:[%s371_s28 + $0x20] sm:$0xff]  ;;  %v429_v18 = vld [vmem:[%s371_s28 + $0x28] sm:$0xff]  ;;  %s1462_s17 = scalar_lea.hbm %s1647_s5, %s1445_s30  ;;  %s1477_s12 = scalar_lea.hbm %s1648_s6, %s1445_s30 }
  0x21   : > { %v430_v20 = vld [vmem:[%s371_s28 + $0x30] sm:$0xff]  ;;  %v431_v21 = vld [vmem:[%s371_s28 + $0x38] sm:$0xff]  ;;  %v1304_v22 = vld [vmem:[%s371_s28 + $0x40] sm:$0x1f]  ;;  %v438_v23 = vsel %vm436_vm1, %v900_v13, %v1284_v8  ;;  %v439_v24 = vmax.f32 %v1287_v10, %v428_v17  ;;  %v451_v25 = vmax.f32 %v1289_v11, %v429_v18  ;;  %590 = vperm.xlu0 %986, %v414_v7  }
  0x22   : > { %v1314_v27 = vld [vmem:[%s371_s28 + $0x48] sm:$0x1f]  ;;  %v440_v28 = vmax.f32 %v1291_v12, %v430_v20  ;;  %v442_v29 = vsel %vm441_vm0, %v1304_v22, -inf  ;;  %v452_v30 = vmax.f32 %v1299_v16, %v431_v21  ;;  %v1320_v31 = vrot.slane %v438_v23, %v520_v9  ;;  %s1650_s28 = sand.u32 1, %s1134_s22  }
  0x23   : > { %v443_v32 = vmax.f32 %v439_v24, %v442_v29  ;;  %v453_v33 = vsel %vm441_vm0, %v1314_v27, -inf  ;;  %v1324_v34 = vrot.slane %v438_v23, %v524_v14  ;;  %s894_s18 = sshll.u32 %s1650_s28, 1  ;;  %s1016_s28 = sshll.u32 %s1154_s16, 4  ;;  %s1017_s28 = int_to_ptr.vmem [resolvable:$false] %s1016_s28 }
  0x24   : > { %v454_v36 = vmax.f32 %v451_v25, %v453_v33  ;;  %vm530_vm2 = vcmp.eq.s32.totalorder %v1297_v15, %v1320_v31  ;;  %vm526_vm3 = vcmp.eq.s32.totalorder %v1263_v4, %v1320_v31  ;;  %vm532_vm4 = vcmp.eq.s32.totalorder %v1302_v19, %v1320_v31  ;;  %s1357_s19 = scalar_lea.vmem [#allocation4], %s894_s18  ;;  %s1362_s20 = scalar_lea.vmem [#allocation2], %s894_s18 }
  0x25   : > { %v444_v37 = vmax.f32 %v443_v32, %v440_v28  ;;  %vm531_vm5 = vcmp.eq.s32.totalorder %v1297_v15, %v1324_v34  ;;  %vm527_vm6 = vcmp.eq.s32.totalorder %v1263_v4, %v1324_v34  ;;  %vm533_vm7 = vcmp.eq.s32.totalorder %v1302_v19, %v1324_v34  ;;  %408 = vst.msk [vmem:[%s1357_s19] sm:$0x3] %vm1353_vm12, %v1153_v52  ;;  %s1367_s8 = scalar_lea.vmem [#allocation6], %s894_s18  ;;  %s704_s14 = sshll.u32 %s1357_s19, 4  ;;  %s1464_s14 = int_to_ptr.vmem [resolvable:$true] %s704_s14 }
  0x26   : > { %v455_v38 = vmax.f32 %v454_v36, %v452_v30  ;;  %vm528_vm8 = vcmp.eq.s32.totalorder %v1312_v26, %v1320_v31  ;;  %vm529_vm9 = vcmp.eq.s32.totalorder %v1312_v26, %v1324_v34  ;;  %vm534_vm10 = vcmp.eq.s32.totalorder %v1327_v35, %v1320_v31  ;;  %407 = vst.msk [vmem:[%s1362_s20] sm:$0x3] %vm1353_vm12, %v1153_v52  ;;  %s719_s24 = sshll.u32 %s1367_s8, 4  ;;  %s1012_s27 = scalar_lea.vmem %s1464_s14, 32  ;;  %s1479_s24 = int_to_ptr.vmem [resolvable:$true] %s719_s24 }
  0x27   : > { %v445_v39 = vrot.slane %v444_v37, 4  ;;  %vm535_vm11 = vcmp.eq.s32.totalorder %v1327_v35, %v1324_v34  ;;  %409 = vst.msk [vmem:[%s1367_s8] sm:$0x3] %vm1353_vm12, %v1153_v52  ;;  %p1013_p12 = scmp.ne.s32.totalorder %s1464_s14, %s1012_s27  ;;  %s1018_s0 = scalar_lea.vmem %s1017_s28, 64 }
  0x28   : > { %v456_v40 = vrot.slane %v455_v38, 4  ;;  %p1019_p1 = scmp.lt.s32.totalorder %s1464_s14, %s1017_s28  ;;  %p1020_p2 = scmp.lt.s32.totalorder %s1018_s0, %s1012_s27 }
  0x29   : > { %v446_v41 = vmax.f32 %v444_v37, %v445_v39  ;;  %p1014_p13 = pnand %p1013_p12, %p1235_p4 }
  0x2a   : > { %v457_v42 = vmax.f32 %v455_v38, %v456_v40  ;;  %p1021_p3 = por %p1020_p2, %p1019_p1 }
  0x2b   : > { %v447_v43 = vrot.slane %v446_v41, 2  ;;  %p1015_p0 = pneg %p1014_p13 }
  0x2c   : > { %v458_v44 = vrot.slane %v457_v42, 2  ;;  %v422_v14 = vld [vmem:[%s1357_s19] sm:$0x3] }
  0x2d   : > { %v448_v45 = vmax.f32 %v446_v41, %v447_v43  ;;  %p1022_p5 = pnand %p1021_p3, %p1015_p0 }
  0x2e   : > { %v459_v46 = vmax.f32 %v457_v42, %v458_v44  ;;  %v423_v24 = vld [vmem:[%s1367_s8] sm:$0x3] }
  0x2f   : > { %v449_v47 = vrot.slane %v448_v45, 1 }
  0x30   : > { %v460_v48 = vrot.slane %v459_v46, 1 }
  0x31   : > { %v450_v49 = vmax.f32 %v448_v45, %v449_v47 }
  0x32   : > { %v461_v50 = vmax.f32 %v459_v46, %v460_v48 }
  0x33   : > { %v1373_v53 = vsub.f32 %v1287_v10, %v450_v49  ;;  %v1378_v55 = vsub.f32 %v428_v17, %v450_v49  ;;  %v1381_v56 = vsub.f32 %v1291_v12, %v450_v49  ;;  %v1400_v62 = vsub.f32 %v430_v20, %v450_v49 }
  0x34   : > { %v1376_v54 = vsub.f32 %v1289_v11, %v461_v50  ;;  %v1383_v57 = vsub.f32 %v429_v18, %v461_v50  ;;  %v1394_v60 = vsub.f32 %v1299_v16, %v461_v50  ;;  %v1402_v63 = vsub.f32 %v431_v21, %v461_v50  ;;  %v435_v16 = vld [vmem:[%s393_s13] sm:$0x3] }
  0x35   : > { %v536_v58 = vsel %vm526_vm3, %v1373_v53, 0.0  ;;  %v540_v61 = vsel %vm530_vm2, %v1378_v55, 0.0  ;;  %v538_v1 = vsel %vm528_vm8, %v1381_v56, 0.0  ;;  %v1417_v3 = vsub.f32 %v1304_v22, %v450_v49 }
  0x36   : > { %v537_v59 = vsel %vm527_vm6, %v1376_v54, 0.0  ;;  %v541_v0 = vsel %vm531_vm5, %v1383_v57, 0.0  ;;  %v539_v2 = vsel %vm529_vm9, %v1394_v60, 0.0  ;;  %v546_v5 = vadd.f32 %v538_v1, %v536_v58 }
  0x37   : > { %v557_v6 = vadd.f32 %v539_v2, %v537_v59  ;;  %v542_v7 = vsel %vm532_vm4, %v1400_v62, 0.0  ;;  %v543_v9 = vsel %vm533_vm7, %v1402_v63, 0.0  ;;  %v1433_v10 = vsub.f32 %v1314_v27, %v461_v50 }
  0x38   : > { %v544_v11 = vsel %vm534_vm10, %v1417_v3, 0.0  ;;  %v547_v12 = vadd.f32 %v546_v5, %v540_v61  ;;  %v902_v20 = vsel %vm436_vm1, 1.0, %v1153_v52  ;;  %vm629_vm13 = vcmp.ge.f32.partialorder %v435_v16, 0.95 }
  0x39   : > { %v558_v13 = vadd.f32 %v557_v6, %v541_v0  ;;  %v545_v17 = vsel %vm535_vm11, %v1433_v10, 0.0  ;;  %v549_v18 = vsel %vm441_vm0, %v544_v11, 0.0  ;;  %v654_v25 = vadd.f32 %v902_v20, %v422_v14 }
  0x3a   : > { %v548_v21 = vadd.f32 %v547_v12, %v542_v7  ;;  %v560_v23 = vsel %vm441_vm0, %v545_v17, 0.0  ;;  %v901_v29 = vsel %vm629_vm13, 1.0, %v1153_v52 }
  0x3b   : > { %v559_v22 = vadd.f32 %v558_v13, %v543_v9  ;;  %661 = vst.msk [vmem:[%s1357_s19] sm:$0x3] %vm1353_vm12, %v654_v25  ;;  %v655_v30 = vadd.f32 %v901_v29, %v423_v24 }
  0x3c   : > { %v1466_v27 = vadd.f32 %v549_v18, %v548_v21 }
  0x3d   : > { %v1468_v28 = vadd.f32 %v560_v23, %v559_v22 }
  0x3e   : > { %1025 = shalt.err (!%p1022_p5)
}
  0x3f   : > { %s1026_s19 = scalar_lea.hbm %s1462_s17, 32  ;;  %s1030_s16 = scalar_lea.hbm %s1647_s5, 64 }
  0x40   : > { %p1027_p6 = scmp.ne.s32.totalorder %s1462_s17, %s1026_s19  ;;  %p1031_p10 = scmp.lt.u32.totalorder %s1462_s17, %s1647_s5 }
  0x41   : > { %p1032_p11 = scmp.lt.u32.totalorder %s1030_s16, %s1026_s19  ;;  %p1034_p13 = scmp.lt.u32.totalorder %s1026_s19, %s1462_s17 }
  0x42   : > { %p1028_p7 = pnand %p1027_p6, %p1235_p4 }
  0x43   : > { %p1033_p12 = por %p1032_p11, %p1031_p10 }
  0x44   : > { %p1029_p9 = pneg %p1028_p7 }
  0x45   : > { %p1035_p0 = por %p1034_p13, %p1033_p12 }
  0x47   : > { %p1036_p1 = pnand %p1035_p0, %p1029_p9 }
  0x49   : > { %1039 = shalt.err (!%p1036_p1)
}
  0x4a   : > { %s1657_s0 = scalar_lea.sflag [#allocation5], %s1441_s15  ;;  %662 = vst.msk [vmem:[%s1367_s8] sm:$0x3] %vm1353_vm12, %v655_v30  ;;  %s1040_s13 = scalar_lea.vmem %s1479_s24, 32 }
  0x4b   : > { %919 = dma.vmem_to_hbm [thread:$0]  (%p1235_p4), %s1464_s14, 32, %s1462_s17, %s1657_s0  }
  0x4c   : > { %p1041_p2 = scmp.ne.s32.totalorder %s1479_s24, %s1040_s13  ;;  %s1155_s27 = smov [#allocation6]  }
  0x4d   : > { %s1044_s19 = sshll.u32 %s1155_s27, 4  ;;  %s1045_s19 = int_to_ptr.vmem [resolvable:$false] %s1044_s19 }
  0x4e   : > { %p1042_p3 = pnand %p1041_p2, %p1235_p4  ;;  %s1046_s18 = scalar_lea.vmem %s1045_s19, 64 }
  0x4f   : > { %p1047_p6 = scmp.lt.s32.totalorder %s1479_s24, %s1045_s19  ;;  %p1048_p7 = scmp.lt.s32.totalorder %s1046_s18, %s1040_s13 }
  0x50   : > { %p1043_p5 = pneg %p1042_p3 }
  0x51   : > { %p1049_p9 = por %p1048_p7, %p1047_p6 }
  0x53   : > { %p1050_p10 = pnand %p1049_p9, %p1043_p5 }
  0x55   : > { %1053 = shalt.err (!%p1050_p10)
}
  0x56   : > { %s1054_s8 = scalar_lea.hbm %s1477_s12, 32  ;;  %s1058_s11 = scalar_lea.hbm %s1648_s6, 64 }
  0x57   : > { %p1055_p11 = scmp.ne.s32.totalorder %s1477_s12, %s1054_s8  ;;  %p1059_p0 = scmp.lt.u32.totalorder %s1477_s12, %s1648_s6 }
  0x58   : > { %p1060_p1 = scmp.lt.u32.totalorder %s1058_s11, %s1054_s8  ;;  %p1062_p3 = scmp.lt.u32.totalorder %s1054_s8, %s1477_s12 }
  0x59   : > { %p1056_p12 = pnand %p1055_p11, %p1235_p4 }
  0x5a   : > { %p1061_p2 = por %p1060_p1, %p1059_p0 }
  0x5b   : > { %p1057_p13 = pneg %p1056_p12 }
  0x5c   : > { %p1063_p5 = por %p1062_p3, %p1061_p2 }
  0x5e   : > { %p1064_p6 = pnand %p1063_p5, %p1057_p13 }
  0x60   : > { %1067 = shalt.err (!%p1064_p6)
}
  0x61   : > { %920 = dma.vmem_to_hbm [thread:$0]  (%p1235_p4), %s1479_s24, 32, %s1477_s12, %s1657_s0   ;;  %v472_v32 = vmul.f32 1.442695, %v1373_v53  ;;  %v474_v33 = vmul.f32 1.442695, %v1376_v54  ;;  %v551_v13 = vrot.slane %v1466_v27, 4 }
  0x62   : > { %v476_v36 = vmul.f32 1.442695, %v1381_v56  ;;  %v478_v37 = vmul.f32 1.442695, %v1394_v60  ;;  %v480_v38 = vmul.f32 1.442695, %v1378_v55  ;;  %s1588_s13 = scalar_lea.hbm %s1646_s4, %s1445_s30 }
  0x63   : > { %988 = vpow2.f32 %v472_v32  ;;  %v482_v39 = vmul.f32 1.442695, %v1383_v57  ;;  %v484_v40 = vmul.f32 1.442695, %v1400_v62  ;;  %v486_v41 = vmul.f32 1.442695, %v1402_v63 }
  0x64   : > { %990 = vpow2.f32 %v474_v33  ;;  %v488_v42 = vmul.f32 1.442695, %v1417_v3  ;;  %v490_v43 = vmul.f32 1.442695, %v1433_v10  ;;  %v562_v14 = vrot.slane %v1468_v28, 4  ;;  %s689_s15 = sshll.u32 %s1362_s20, 4  ;;  %s1590_s15 = int_to_ptr.vmem [resolvable:$true] %s689_s15 }
  0x65   : > { %992 = vpow2.f32 %v476_v36  ;;  %v552_v21 = vadd.f32 %v551_v13, %v1466_v27  ;;  %s1658_s27 = sand.u32 1, %s1134_s22   ;;  %s1068_s18 = scalar_lea.vmem %s1590_s15, 32 }
  0x66   : > { %994 = vpow2.f32 %v478_v37  ;;  %v563_v22 = vadd.f32 %v562_v14, %v1468_v28  ;;  %s664_s19 = scalar_lea.sflag [#allocation3], %s1658_s27  ;;  %p1069_p7 = scmp.ne.s32.totalorder %s1590_s15, %s1068_s18 }
  0x67   : > { %996 = vpow2.f32 %v480_v38  ;;  %v553_v24 = vrot.slane %v552_v21, 2  ;;  %s1157_s8 = smov [#allocation2]  }
  0x68   : > { %998 = vpow2.f32 %v482_v39  ;;  %v564_v25 = vrot.slane %v563_v22, 2  ;;  %p1070_p9 = pnand %p1069_p7, %p1235_p4  ;;  %s1072_s14 = sshll.u32 %s1157_s8, 4  ;;  %s1073_s14 = int_to_ptr.vmem [resolvable:$false] %s1072_s14 }
  0x69   : > { %1000 = vpow2.f32 %v484_v40  ;;  %s1074_s30 = scalar_lea.vmem %s1073_s14, 64  ;;  %p1075_p11 = scmp.lt.s32.totalorder %s1590_s15, %s1073_s14 }
  0x6a   : > { %1002 = vpow2.f32 %v486_v41  ;;  %p1071_p10 = pneg %p1070_p9  ;;  %p1076_p12 = scmp.lt.s32.totalorder %s1074_s30, %s1068_s18 }
  0x6b   : > { %1004 = vpow2.f32 %v488_v42  ;;  %v554_v42 = vadd.f32 %v553_v24, %v552_v21 }
  0x6c   : > { %1006 = vpow2.f32 %v490_v43  ;;  %v565_v43 = vadd.f32 %v564_v25, %v563_v22  ;;  %p1077_p13 = por %p1076_p12, %p1075_p11 }
  0x6d   : > { %v989_v44 = vpop.eup %988 }
  0x6e   : > { %v991_v45 = vpop.eup %990  ;;  %v566_v19 = vrot.slane %v565_v43, 1  ;;  %p1078_p0 = pnand %p1077_p13, %p1071_p10 }
  0x6f   : > { %v993_v46 = vpop.eup %992 }
  0x70   : > { %v995_v47 = vpop.eup %994  ;;  %v492_v48 = vadd.f32 %v993_v46, %v989_v44  ;;  %v567_v35 = vadd.f32 %v566_v19, %v565_v43 }
  0x71   : > { %v997_v49 = vpop.eup %996  ;;  %v503_v50 = vadd.f32 %v995_v47, %v991_v45 }
  0x72   : > { %v999_v52 = vpop.eup %998  ;;  %v493_v54 = vadd.f32 %v997_v49, %v492_v48 }
  0x73   : > { %v1001_v53 = vpop.eup %1000  ;;  %v504_v56 = vadd.f32 %v999_v52, %v503_v50 }
  0x74   : > { %v1003_v55 = vpop.eup %1002  ;;  %v494_v59 = vadd.f32 %v1001_v53, %v493_v54  ;;  %v555_v54 = vrot.slane %v554_v42, 1 }
  0x75   : > { %v1005_v57 = vpop.eup %1004  ;;  %v505_v60 = vadd.f32 %v1003_v55, %v504_v56 }
  0x76   : > { %v1007_v58 = vpop.eup %1006  ;;  %v495_v61 = vsel %vm441_vm0, %v1005_v57, 0.0  ;;  %v556_v34 = vadd.f32 %v555_v54, %v554_v42 }
  0x77   : > { %v506_v62 = vsel %vm441_vm0, %v1007_v58, 0.0  ;;  %v496_v63 = vadd.f32 %v495_v61, %v494_v59  ;;  %v1156_v59 = vmov 1966171168  }
  0x78   : > { %v507_v0 = vadd.f32 %v506_v62, %v505_v60  ;;  %v636_v60 = vunpack.c.l.s4 %v1156_v59 }
  0x79   : > { %v497_v1 = vrot.slane %v496_v63, 4 }
  0x7a   : > { %v508_v2 = vrot.slane %v507_v0, 4 }
  0x7b   : > { %v498_v3 = vadd.f32 %v497_v1, %v496_v63 }
  0x7c   : > { %v509_v5 = vadd.f32 %v508_v2, %v507_v0 }
  0x7d   : > { %v499_v6 = vrot.slane %v498_v3, 2 }
  0x7e   : > { %v510_v7 = vrot.slane %v509_v5, 2 }
  0x7f   : > { %v500_v9 = vadd.f32 %v499_v6, %v498_v3  ;;  %v637_v3 = vunpack.c.0.s8 %v636_v60 }
  0x80   : > { %v511_v10 = vadd.f32 %v510_v7, %v509_v5 }
  0x81   : > { %v501_v11 = vrot.slane %v500_v9, 1  ;;  %v640_v14 = vsub.s32 %v637_v3, %v1263_v4 }
  0x82   : > { %v512_v12 = vrot.slane %v511_v10, 1 }
  0x83   : > { %v502_v16 = vadd.f32 %v501_v11, %v500_v9 }
  0x84   : > { %v513_v20 = vadd.f32 %v512_v12, %v511_v10 }
  0x85   : > { %1008 = vlog2.f32 %v502_v16 }
  0x86   : > { %1010 = vlog2.f32 %v513_v20 }
  0x8f   : > { %v1009_v53 = vpop.eup %1008 }
  0x90   : > { %v1011_v55 = vpop.eup %1010  ;;  %v515_v61 = vmul.f32 0.6931472, %v1009_v53 }
  0x91   : > { %v517_v62 = vmul.f32 0.6931472, %v1011_v55 }
  0x92   : > { %v625_v7 = vsub.f32 %v515_v61, %v556_v34 }
  0x93   : > { %v626_v9 = vsub.f32 %v517_v62, %v567_v35 }
  0x98   : > { %v581_v17 = vpop.permute.xlu1 %580  ;;  %v571_v18 = vpop.permute.xlu0 %570 }
  0x99   : > { %v593_v29 = vsel %vm526_vm3, %v571_v18, 0.0  ;;  %v594_v30 = vsel %vm527_vm6, %v571_v18, 0.0  ;;  %v597_v37 = vsel %vm530_vm2, %v581_v17, 0.0  ;;  %v598_v38 = vsel %vm531_vm5, %v581_v17, 0.0  ;;  %v421_v18 = vld [vmem:[%s1362_s20] sm:$0x3] }
  0x9c   : > { %v576_v23 = vpop.permute.xlu0 %575  ;;  %v586_v28 = vpop.permute.xlu1 %585 }
  0x9d   : > { %v595_v32 = vsel %vm528_vm8, %v576_v23, 0.0  ;;  %v596_v27 = vsel %vm529_vm9, %v576_v23, 0.0  ;;  %v599_v26 = vsel %vm532_vm4, %v586_v28, 0.0  ;;  %v600_v44 = vsel %vm533_vm7, %v586_v28, 0.0 }
  0x9e   : > { %v603_v33 = vadd.f32 %v595_v32, %v593_v29  ;;  %v614_v36 = vadd.f32 %v596_v27, %v594_v30 }
  0xa0   : > { %v604_v39 = vadd.f32 %v603_v33, %v597_v37  ;;  %v615_v40 = vadd.f32 %v614_v36, %v598_v38  ;;  %v591_v41 = vpop.permute.xlu0 %590 }
  0xa1   : > { %v601_v45 = vsel %vm534_vm10, %v591_v41, 0.0  ;;  %v602_v15 = vsel %vm535_vm11, %v591_v41, 0.0 }
  0xa2   : > { %v605_v46 = vadd.f32 %v604_v39, %v599_v26  ;;  %v606_v47 = vsel %vm441_vm0, %v601_v45, 0.0  ;;  %v616_v48 = vadd.f32 %v615_v40, %v600_v44  ;;  %v617_v49 = vsel %vm441_vm0, %v602_v15, 0.0 }
  0xa4   : > { %v607_v50 = vadd.f32 %v606_v47, %v605_v46  ;;  %v618_v52 = vadd.f32 %v617_v49, %v616_v48 }
  0xa6   : > { %v608_v56 = vrot.slane %v607_v50, 4  ;;  %v619_v57 = vrot.slane %v618_v52, 4 }
  0xa8   : > { %v609_v31 = vadd.f32 %v608_v56, %v607_v50  ;;  %v620_v58 = vadd.f32 %v619_v57, %v618_v52 }
  0xaa   : > { %v610_v63 = vrot.slane %v609_v31, 2  ;;  %v621_v0 = vrot.slane %v620_v58, 2 }
  0xac   : > { %v611_v1 = vadd.f32 %v610_v63, %v609_v31  ;;  %v622_v2 = vadd.f32 %v621_v0, %v620_v58 }
  0xae   : > { %v612_v5 = vrot.slane %v611_v1, 1  ;;  %v623_v6 = vrot.slane %v622_v2, 1 }
  0xb0   : > { %v613_v10 = vadd.f32 %v612_v5, %v611_v1  ;;  %v624_v11 = vadd.f32 %v623_v6, %v622_v2 }
  0xb2   : > { %v627_v12 = vmul.f32 %v625_v7, %v613_v10  ;;  %v628_v13 = vmul.f32 %v626_v9, %v624_v11 }
  0xb4   : > { %v634_v16 = vcombine.low %v627_v12, %v628_v13 }
  0xb6   : > { %v641_v17 = vrot.slane %v634_v16, %v640_v14 }
  0xb8   : > { %v648_v20 = vrot.slane %v641_v17, %v640_v14 }
  0xba   : > { %v650_v21 = vsel %vm436_vm1, %v648_v20, 0.0 }
  0xbb   : > { %v651_v22 = vadd.f32 %v650_v21, %v421_v18 }
  0xbd   : > { %660 = vst.msk [vmem:[%s1362_s20] sm:$0x3] %vm1353_vm12, %v651_v22 }
  0xbe   : > { %1081 = shalt.err (!%p1078_p0)
}
  0xbf   : > { %s1082_s20 = scalar_lea.hbm %s1588_s13, 32  ;;  %s1086_s16 = scalar_lea.hbm %s1646_s4, 64 }
  0xc0   : > { %p1083_p1 = scmp.ne.s32.totalorder %s1588_s13, %s1082_s20  ;;  %p1087_p5 = scmp.lt.u32.totalorder %s1588_s13, %s1646_s4 }
  0xc1   : > { %p1088_p6 = scmp.lt.u32.totalorder %s1086_s16, %s1082_s20  ;;  %p1090_p9 = scmp.lt.u32.totalorder %s1082_s20, %s1588_s13 }
  0xc2   : > { %p1084_p2 = pnand %p1083_p1, %p1235_p4 }
  0xc3   : > { %p1089_p7 = por %p1088_p6, %p1087_p5 }
  0xc4   : > { %p1085_p3 = pneg %p1084_p2 }
  0xc5   : > { %p1091_p10 = por %p1090_p9, %p1089_p7 }
  0xc7   : > { %p1092_p11 = pnand %p1091_p10, %p1085_p3 }
  0xc9   : > { %1095 = shalt.err (!%p1092_p11)
}
  0xca   : > { %918 = dma.vmem_to_hbm [thread:$0]  (%p1235_p4), %s1590_s15, 32, %s1588_s13, %s664_s19  }
  0xcb PF: > { %p934_p12 = scmp.ge.s32.totalorder %s1150_s26, 2  ;;  %s731_s24 = sand.u32 1, %s1130_s21  }
  0xcc   : > { %s732_s12 = scalar_lea.sflag [#allocation3], %s731_s24 }
  0xcd   : > { %p925_p13 = pnand %p934_p12, %p1244_p8 }
  0xcf   : > { %1121 = dma.done.wait (!%p925_p13), %s732_s12, 32  }
  0xd0   : > { %1123 = vsyncadd (!%p925_p13), %s732_s12, 4294967264  ;;  %s1659_s27 = sadd.s32 4294967294, %s1150_s26  }
  0xd1   : > { %s740_s18 = sand.u32 1, %s1659_s27  }
  0xd2   : > { %s741_s8 = scalar_lea.sflag [#allocation5], %s740_s18 }
  0xd3   : > { %1125 = dma.done.wait (!%p925_p13), %s741_s8, 64  }
  0xd4   : > { %1127 = vsyncadd (!%p925_p13), %s741_s8, 4294967232  ;;  %s23_s26 = sadd.s32 1, %s1150_s26   ;;  %s1660_s21 = smov %s1134_s22 }
  0xd5   : > { %p20_p4 = scmp.ge.s32.totalorder %s23_s26, 4   ;;  %s1661_s22 = smov %s1138_s23 }
  0xd6   : > { %s1662_s23 = smov %s1250_s10  ;;  %s1663_s24 = smov %s1146_s25 }
  0xd7   : > { %s1664_s25 = smov %s1666_s29  ;;  %22 = sbr.rel (!%p20_p4) target bundleno = 8 (0x8), region = 113 }
  0xde   :  { %755 = vsyncpa [#allocation3], 1 }
  0xdf   :  { %757 = vsyncpa [#allocation3 + $0x1], 1 }
  0xe0   :  { %758 = vsyncpa [#allocation5], 1 }
  0xe1   :  { %760 = vsyncpa [#allocation5 + $0x1], 1 }

</bundles_post_ra>
